<compile_context>
chip_gen: v6e
topology: v6e:2x2x1
jax: 0.10.0
libtpu: 0.0.40
codegen_flags: <defaults>
</compile_context>

<pallas_src>
import functools

import jax
import jax.numpy as jnp
from jax import lax
from jax.experimental import pallas as pl
from jax.experimental.pallas import tpu as pltpu


def _round_up(x: int, n: int) -> int:
    return ((x + n - 1) // n) * n


def _vmem_capacity_bytes() -> int:
    try:
        return int(pltpu.get_tpu_info().vmem_capacity_bytes)
    except Exception:
        return 64 << 20            # conservative default (v7x-sized)


_VMEM_CAP = _vmem_capacity_bytes()


def _gelu_exact(x):
    # PyTorch F.gelu default (exact erf form), computed in x's dtype so the
    # first GELU can run in bf16 while the second stays in f32.
    inv_sqrt2 = jnp.asarray(0.7071067811865476, dtype=x.dtype)
    return 0.5 * x * (1.0 + lax.erf(x * inv_sqrt2))


def fcblock_kernel(x_ref, w1_ref, b1_ref, w2_ref, b2_ref, o_ref):
    x = x_ref[...]                                      # (tm, feat) f32
    xb = x.astype(jnp.bfloat16)                         # bf16 MXU operand
    # Matmul 1 (f32 accumulation), then bias + GELU in bf16: its only
    # consumer is the bf16 second matmul, so bf16 here loses nothing.
    h = jnp.dot(xb, w1_ref[...], preferred_element_type=jnp.float32)
    h = _gelu_exact(h.astype(jnp.bfloat16) + b1_ref[...])
    # Matmul 2; bias + GELU + residual in f32.
    y = jnp.dot(h, w2_ref[...], preferred_element_type=jnp.float32)
    y = _gelu_exact(y + b2_ref[...])
    o_ref[...] = (x + y).astype(o_ref.dtype)


@functools.partial(jax.jit,
                   static_argnames=("size", "fold", "used", "feat", "tm_max"))
def _fcblock_apply(x, w1f, b1f, w2f, b2f, *, size, fold, used, feat,
                   tm_max=4096):
    lead = x.shape[:-1]
    x2d = x.reshape(-1, size)
    m = x2d.shape[0]

    # Single combined pad, only when strictly needed: enough rows so that
    # (a) rows pack evenly into `fold`-wide groups and (b) there are at least
    # 8 packed rows (sublane tile).  No tm-sized pad: the grid below uses
    # pl.cdiv and Pallas masks the ragged last block in-kernel.
    mf = max(-(-m // fold), 8)
    m_pad = mf * fold - m
    if m_pad:
        x2d = jnp.pad(x2d, ((0, m_pad), (0, 0)))
    xf = x2d.reshape(mf, used)                  # free reshape when no pad
    if used != feat:                            # lane padding (128 % size != 0)
        xf = jnp.pad(xf, ((0, 0), (0, feat - used)))

    # ---- Tile size: VMEM-budget- and megacore-aware. ------------------------
    # Pipeline double-buffers even constant-index weights: count 2 buffers.
    weight_bytes = 2 * (2 * feat * feat * 2) + 2 * (2 * feat * 2 + 2 * feat * 4)
    vmem_target = min(_VMEM_CAP * 3 // 4, 40 << 20)
    tile_budget = max(vmem_target - weight_bytes, 1 << 20)
    tm = min(tm_max, int(tile_budget // (4 * feat * 4)))   # 2 bufs x (in+out) f32
    tm = min(tm, _round_up(pl.cdiv(mf, 2), 8))  # >=2 grid steps for v7x megacore
    tm = min(tm, (mf // 8) * 8)                 # block rows never exceed array rows
    tm = max(8, (tm // 8) * 8)
    grid = (pl.cdiv(mf, tm),)

    need = weight_bytes + 4 * tm * feat * 4 + (2 << 20)
    vmem_limit = int(max(16 << 20, min(need, _VMEM_CAP * 3 // 4)))

    cost = pl.CostEstimate(
        flops=int(4 * mf * feat * feat),                 # two folded matmuls
        transcendentals=int(2 * mf * feat),              # two erf per element
        bytes_accessed=int(2 * mf * feat * 4             # x in + out (f32)
                           + 2 * feat * feat * 2         # bf16 weights
                           + feat * 2 + feat * 4),       # biases
    )

    out = pl.pallas_call(
        fcblock_kernel,
        out_shape=jax.ShapeDtypeStruct((mf, feat), x.dtype),
        grid=grid,
        in_specs=[
            pl.BlockSpec((tm, feat), lambda i: (i, 0)),      # x tile (pipelined)
            pl.BlockSpec((feat, feat), lambda i: (0, 0)),    # W1 (VMEM resident)
            pl.BlockSpec((1, feat), lambda i: (0, 0)),       # b1 (bf16)
            pl.BlockSpec((feat, feat), lambda i: (0, 0)),    # W2 (VMEM resident)
            pl.BlockSpec((1, feat), lambda i: (0, 0)),       # b2 (f32)
        ],
        out_specs=pl.BlockSpec((tm, feat), lambda i: (i, 0)),
        compiler_params=pltpu.CompilerParams(
            dimension_semantics=("parallel",),
            vmem_limit_bytes=vmem_limit,
        ),
        cost_estimate=cost,
    )(xf, w1f, b1f, w2f, b2f)

    # Unfold; strip padding only if it was added.
    if used != feat:
        out = out[:, :used]
    out = out.reshape(mf * fold, size)
    if m_pad:
        out = out[:m]
    return out.reshape(*lead, size)


class FCBlockPallas:
    """Residual MLP block: out = x + gelu(gelu(x @ W1 + b1) @ W2 + b2).

    Folded (block-diagonal, lane-dense) bf16 weights and tiled biases are
    built once here, outside the per-call hot path.
    w1, w2 are (in, out) = PyTorch Linear .weight.T; b1, b2 are (size,).
    """

    def __init__(self, w1, b1, w2, b2):
        size = int(w1.shape[0])
        assert w1.shape == (size, size) and w2.shape == (size, size)
        fold = max(1, 128 // size)          # samples packed per 128-lane row
        used = fold * size
        feat = _round_up(used, 128)         # zero-padded lanes if 128 % size != 0

        eye = jnp.eye(fold, dtype=jnp.float32)
        w1f = jnp.kron(eye, w1.astype(jnp.float32))
        w2f = jnp.kron(eye, w2.astype(jnp.float32))
        b1f = jnp.tile(b1.astype(jnp.float32), fold)
        b2f = jnp.tile(b2.astype(jnp.float32), fold)
        if used != feat:
            pad = feat - used
            w1f = jnp.pad(w1f, ((0, pad), (0, pad)))
            w2f = jnp.pad(w2f, ((0, pad), (0, pad)))
            b1f = jnp.pad(b1f, (0, pad))
            b2f = jnp.pad(b2f, (0, pad))

        self.size, self.fold, self.used, self.feat = size, fold, used, feat
        self.w1f = jax.device_put(w1f.astype(jnp.bfloat16))
        self.w2f = jax.device_put(w2f.astype(jnp.bfloat16))
        self.b1f = jax.device_put(b1f.astype(jnp.bfloat16).reshape(1, feat))
        self.b2f = jax.device_put(b2f.reshape(1, feat))   # f32 for GELU #2

    def __call__(self, x):
        return _fcblock_apply(x, self.w1f, self.b1f, self.w2f, self.b2f,
                              size=self.size, fold=self.fold,
                              used=self.used, feat=self.feat)


# ------------------------------ references ----------------------------------
def fcblock_reference_f32(x, w1, b1, w2, b2):
    y = jax.nn.gelu(x @ w1 + b1, approximate=False)
    y = jax.nn.gelu(y @ w2 + b2, approximate=False)
    return x + y


def fcblock_reference_bf16(x, w1, b1, w2, b2):
    # Matches kernel numerics: bf16 MXU operands + f32 accumulation,
    # first bias/GELU in bf16, second bias/GELU and residual in f32.
    h = jnp.dot(x.astype(jnp.bfloat16), w1.astype(jnp.bfloat16),
                preferred_element_type=jnp.float32)
    h = jax.nn.gelu(h.astype(jnp.bfloat16) + b1.astype(jnp.bfloat16),
                    approximate=False)
    y = jnp.dot(h, w2.astype(jnp.bfloat16),
                preferred_element_type=jnp.float32) + b2
    y = jax.nn.gelu(y, approximate=False)
    return x + y


if __name__ == "__main__":
    size = 32            # FCBlock(size=32)
    batch, seq = 2, 8

    key = jax.random.PRNGKey(0)
    kx, kw1, kb1, kw2, kb2 = jax.random.split(key, 5)

    x = jax.random.normal(kx, (batch, seq, size), dtype=jnp.float32)

    # Deterministic "synthetic checkpoint": PyTorch Linear weight is (out, in);
    # init in that convention then transpose to (in, out) for the kernel.
    bound = 1.0 / jnp.sqrt(size)
    w1_pt = jax.random.uniform(kw1, (size, size), minval=-bound, maxval=bound)
    b1 = jax.random.uniform(kb1, (size,), minval=-bound, maxval=bound)
    w2_pt = jax.random.uniform(kw2, (size, size), minval=-bound, maxval=bound)
    b2 = jax.random.uniform(kb2, (size,), minval=-bound, maxval=bound)
    w1 = w1_pt.T
    w2 = w2_pt.T

    block = FCBlockPallas(w1, b1, w2, b2)      # weights folded once, hoisted
    out = block(x)
    out = jax.block_until_ready(out)
    assert out.shape == x.shape

    # Tight check vs a reference with matching bf16-MXU / bf16-GELU#1 numerics.
    ref_bf16 = fcblock_reference_bf16(x, w1, b1, w2, b2)
    assert jnp.allclose(out, ref_bf16, atol=3e-2, rtol=3e-2), \
        "mismatch vs bf16 reference"

    # Looser check vs the full-f32 PyTorch-equivalent reference.
    ref_f32 = fcblock_reference_f32(x, w1, b1, w2, b2)
    assert jnp.allclose(out, ref_f32, atol=5e-2, rtol=5e-2), \
        "mismatch vs f32 reference"

    print("KERNEL_OK")
</pallas_src>

<mosaic_0001>
module attributes {stable_mosaic.version = 11 : i64} {
  func.func @fcblock_kernel(%arg0: i32, %arg1: memref<8x128xf32, #tpu.memory_space<vmem>>, %arg2: memref<128x128xbf16, #tpu.memory_space<vmem>>, %arg3: memref<1x128xbf16, #tpu.memory_space<vmem>>, %arg4: memref<128x128xbf16, #tpu.memory_space<vmem>>, %arg5: memref<1x128xf32, #tpu.memory_space<vmem>>, %arg6: memref<8x128xf32, #tpu.memory_space<vmem>>) attributes {dimension_semantics = [#tpu.dimension_semantics<parallel>], iteration_bounds = array<i64: 1>, scalar_prefetch = 0 : i64, scratch_operands = 0 : i64, tpu.core_type = #tpu.core_type<tc>, window_params = [{transform_indices = @transform_0, window_bounds = array<i64: 8, 128>}, {pipeline_mode = #tpu.pipeline_mode<synchronous>, transform_indices = @transform_1, window_bounds = array<i64: 128, 128>}, {pipeline_mode = #tpu.pipeline_mode<synchronous>, transform_indices = @transform_2, window_bounds = array<i64: 1, 128>}, {pipeline_mode = #tpu.pipeline_mode<synchronous>, transform_indices = @transform_3, window_bounds = array<i64: 128, 128>}, {pipeline_mode = #tpu.pipeline_mode<synchronous>, transform_indices = @transform_4, window_bounds = array<i64: 1, 128>}, {transform_indices = @transform_5, window_bounds = array<i64: 8, 128>}]} {
    %c0 = arith.constant 0 : index
    %c0_0 = arith.constant 0 : index
    %0 = vector.load %arg1[%c0, %c0_0] : memref<8x128xf32, #tpu.memory_space<vmem>>, vector<8x128xf32>
    %1 = arith.truncf %0 : vector<8x128xf32> to vector<8x128xbf16>
    %c0_1 = arith.constant 0 : index
    %c0_2 = arith.constant 0 : index
    %2 = vector.load %arg2[%c0_1, %c0_2] : memref<128x128xbf16, #tpu.memory_space<vmem>>, vector<128x128xbf16>
    %cst = arith.constant dense<0.000000e+00> : vector<8x128xf32>
    %3 = tpu.matmul %1, %2, %cst {dimension_numbers = #tpu.dot_dimension_numbers<[1], [0], [0], [1], [0, 0, 1, 1], [], []>} : vector<8x128xbf16>, vector<128x128xbf16>, vector<8x128xf32> -> vector<8x128xf32>
    %4 = arith.truncf %3 : vector<8x128xf32> to vector<8x128xbf16>
    %c0_3 = arith.constant 0 : index
    %c0_4 = arith.constant 0 : index
    %5 = vector.load %arg3[%c0_3, %c0_4] : memref<1x128xbf16, #tpu.memory_space<vmem>>, vector<1x128xbf16>
    %6 = vector.broadcast %5 : vector<1x128xbf16> to vector<8x128xbf16>
    %7 = arith.addf %4, %6 : vector<8x128xbf16>
    %cst_5 = arith.constant 5.000000e-01 : bf16
    %8 = vector.broadcast %cst_5 : bf16 to vector<8x128xbf16>
    %9 = arith.mulf %8, %7 : vector<8x128xbf16>
    %cst_6 = arith.constant 7.070310e-01 : bf16
    %10 = vector.broadcast %cst_6 : bf16 to vector<8x128xbf16>
    %11 = arith.mulf %7, %10 : vector<8x128xbf16>
    %12 = math.erf %11 : vector<8x128xbf16>
    %cst_7 = arith.constant 1.000000e+00 : bf16
    %13 = vector.broadcast %cst_7 : bf16 to vector<8x128xbf16>
    %14 = arith.addf %13, %12 : vector<8x128xbf16>
    %15 = arith.mulf %9, %14 : vector<8x128xbf16>
    %c0_8 = arith.constant 0 : index
    %c0_9 = arith.constant 0 : index
    %16 = vector.load %arg4[%c0_8, %c0_9] : memref<128x128xbf16, #tpu.memory_space<vmem>>, vector<128x128xbf16>
    %cst_10 = arith.constant dense<0.000000e+00> : vector<8x128xf32>
    %17 = tpu.matmul %15, %16, %cst_10 {dimension_numbers = #tpu.dot_dimension_numbers<[1], [0], [0], [1], [0, 0, 1, 1], [], []>} : vector<8x128xbf16>, vector<128x128xbf16>, vector<8x128xf32> -> vector<8x128xf32>
    %c0_11 = arith.constant 0 : index
    %c0_12 = arith.constant 0 : index
    %18 = vector.load %arg5[%c0_11, %c0_12] : memref<1x128xf32, #tpu.memory_space<vmem>>, vector<1x128xf32>
    %19 = vector.broadcast %18 : vector<1x128xf32> to vector<8x128xf32>
    %20 = arith.addf %17, %19 : vector<8x128xf32>
    %cst_13 = arith.constant 5.000000e-01 : f32
    %21 = vector.broadcast %cst_13 : f32 to vector<8x128xf32>
    %22 = arith.mulf %21, %20 : vector<8x128xf32>
    %cst_14 = arith.constant 0.707106769 : f32
    %23 = vector.broadcast %cst_14 : f32 to vector<8x128xf32>
    %24 = arith.mulf %20, %23 : vector<8x128xf32>
    %25 = math.erf %24 : vector<8x128xf32>
    %cst_15 = arith.constant 1.000000e+00 : f32
    %26 = vector.broadcast %cst_15 : f32 to vector<8x128xf32>
    %27 = arith.addf %26, %25 : vector<8x128xf32>
    %28 = arith.mulf %22, %27 : vector<8x128xf32>
    %29 = arith.addf %0, %28 : vector<8x128xf32>
    %c0_16 = arith.constant 0 : index
    %c0_17 = arith.constant 0 : index
    %30 = vector.load %arg6[%c0_16, %c0_17] : memref<8x128xf32, #tpu.memory_space<vmem>>, vector<8x128xf32>
    tpu.vector_store %arg6[%c0_16, %c0_17], %29 {strides = array<i32>} : memref<8x128xf32, #tpu.memory_space<vmem>>, vector<8x128xf32>,
    return
  }
  func.func @transform_0(%arg0: i32) -> (i32, i32) {
    %c0_i32 = arith.constant 0 : i32
    %c0_i32_0 = arith.constant 0 : i32
    return %arg0, %c0_i32 : i32, i32
  }
  func.func @transform_1(%arg0: i32) -> (i32, i32) {
    %c0_i32 = arith.constant 0 : i32
    %c0_i32_0 = arith.constant 0 : i32
    %c0_i32_1 = arith.constant 0 : i32
    return %c0_i32, %c0_i32_0 : i32, i32
  }
  func.func @transform_2(%arg0: i32) -> (i32, i32) {
    %c0_i32 = arith.constant 0 : i32
    %c0_i32_0 = arith.constant 0 : i32
    %c0_i32_1 = arith.constant 0 : i32
    return %c0_i32, %c0_i32_0 : i32, i32
  }
  func.func @transform_3(%arg0: i32) -> (i32, i32) {
    %c0_i32 = arith.constant 0 : i32
    %c0_i32_0 = arith.constant 0 : i32
    %c0_i32_1 = arith.constant 0 : i32
    return %c0_i32, %c0_i32_0 : i32, i32
  }
  func.func @transform_4(%arg0: i32) -> (i32, i32) {
    %c0_i32 = arith.constant 0 : i32
    %c0_i32_0 = arith.constant 0 : i32
    %c0_i32_1 = arith.constant 0 : i32
    return %c0_i32, %c0_i32_0 : i32, i32
  }
  func.func @transform_5(%arg0: i32) -> (i32, i32) {
    %c0_i32 = arith.constant 0 : i32
    %c0_i32_0 = arith.constant 0 : i32
    return %arg0, %c0_i32 : i32, i32
  }
}

</mosaic_0001>

<bundles_post_ra>
// kernel: _fcblock_apply.1
= control target key start
LH: loop header
LB: loop body
LE: loop exit
PB: predicated region body
PF: predicated region fallthrough
CT: control target
= control target key end

     0   :  { %10 = vsyncpa [#allocation3], 0  ;;  %s404_s18 = smov [#allocation2]   ;;  %s478_s0 = inlined_call_operand.vmem [shape: f32[8,128], index: 0, kind: input, shape index: {}]   ;;  %s479_s1 = inlined_call_operand.vmem [shape: bf16[128,128], index: 1, kind: input, shape index: {}]   ;;  %s480_s2 = inlined_call_operand.vmem [shape: bf16[1,128], index: 2, kind: input, shape index: {}]   ;;  %s481_s3 = inlined_call_operand.hbm [shape: bf16[128,128], index: 3, kind: input, shape index: {}]   ;;  %s482_s4 = inlined_call_operand.vmem [shape: f32[1,128], index: 4, kind: input, shape index: {}]   ;;  %s483_s5 = inlined_call_operand.vmem [shape: f32[8,128], index: 5, kind: output, shape index: {}]  }
   0x1   :  { %s22_s19 = sshll.u32 %s404_s18, 4  ;;  %s23_s19 = int_to_ptr.vmem [resolvable:$true] %s22_s19 }
   0x2   :  { %s390_s20 = scalar_lea.vmem %s23_s19, 1024  ;;  %p395_p1 = scmp.lt.s32.totalorder %s23_s19, %s23_s19 }
   0x3   :  { %p391_p0 = scmp.ne.s32.totalorder %s23_s19, %s390_s20  ;;  %p396_p2 = scmp.lt.s32.totalorder %s390_s20, %s390_s20 }
   0x5   :  { %p397_p3 = por %p396_p2, %p395_p1 }
   0x7   :  { %p398_p4 = pnand %p397_p3, %p391_p0 }
   0x9   :  { %401 = shalt.err (!%p398_p4)
}
   0xa   :  { %s405_s21 = smov 64   ;;  %s406_s22 = smov 4  }
   0xb   :  { %28 = dma.hbm_to_vmem [thread:$0]  %s481_s3, 1024, %s23_s19, [#allocation3], %s405_s21, %s405_s21, %s406_s22  }
   0xc   :  { %402 = dma.done.wait [#allocation3], 1024  }
   0xd   :  { %403 = vsyncadd [#allocation3], 4294966272  ;;  %v407_v0 = vmov 0.0   ;;  %vm408_vm0 = vmmov 0   ;;  %v362_v1 = vld [vmem:[%s479_s1 + $0x38] sm:$0xff]   ;;  %v363_v2 = vld [vmem:[%s479_s1 + $0x30] sm:$0xff]   ;;  %v149_v19 = vlaneseq }
   0xe   :  { %317 = vmatprep.subr.bf16.mxu0 %v407_v0  ;;  %333 = vmatprep.mubr.msk.bf16.mxu0 %vm408_vm0, %v407_v0  ;;  %v364_v3 = vld [vmem:[%s479_s1 + $0x28] sm:$0xff]   ;;  %v365_v4 = vld [vmem:[%s479_s1 + $0x20] sm:$0xff]   ;;  %v370_v5 = vld [vmem:[#allocation2 + $0x38] sm:$0xff]  }
   0xf   :  { %337 = vmatprep.subr.bf16.mxu1 %v407_v0  ;;  %353 = vmatprep.mubr.msk.bf16.mxu1 %vm408_vm0, %v407_v0  ;;  %v371_v6 = vld [vmem:[#allocation2 + $0x30] sm:$0xff]   ;;  %v366_v7 = vld [vmem:[%s479_s1 + $0x18] sm:$0xff]   ;;  %v368_v9 = vld [vmem:[%s479_s1 + $0x8] sm:$0xff]   ;;  %v150_v20 = vshrl.u32 %v149_v19, 7 }
  0x10   :  { %318 = vmatpush3.bf16.msra.mxu0 %v362_v1  ;;  %338 = vmatpush3.bf16.msra.mxu1 %v370_v5  ;;  %v367_v8 = vld [vmem:[%s479_s1 + $0x10] sm:$0xff]   ;;  %v369_v10 = vld [vmem:[%s479_s1] sm:$0xff]   ;;  %v372_v13 = vld [vmem:[#allocation2 + $0x28] sm:$0xff]  }
  0x11   :  { %319 = vmatprep.subr.bf16.mxu0 %v407_v0  ;;  %339 = vmatprep.subr.bf16.mxu1 %v407_v0  ;;  %v38_v11 = vld [vmem:[%s478_s0] sm:$0xff]  ;;  %v374_v15 = vld [vmem:[#allocation2 + $0x18] sm:$0xff]   ;;  %v375_v16 = vld [vmem:[#allocation2 + $0x10] sm:$0xff]   ;;  %v151_v23 = vsub.s32 0, %v150_v20 }
  0x12   :  { %v39_v12 = vpack.c.bf16 %v38_v11, %v38_v11  ;;  %v373_v14 = vld [vmem:[#allocation2 + $0x20] sm:$0xff]   ;;  %v376_v17 = vld [vmem:[#allocation2 + $0x8] sm:$0xff]  }
  0x13   :  { %v377_v18 = vld [vmem:[#allocation2] sm:$0xff]  }
  0x14   :  { %320 = vmatpush3.bf16.msra.mxu0 %v363_v2  ;;  %340 = vmatpush3.bf16.msra.mxu1 %v371_v6  ;;  %v145_v21 = vld [vmem:[%s480_s2] sm:$0x1] }
  0x15   :  { %321 = vmatprep.subr.bf16.mxu0 %v407_v0  ;;  %341 = vmatprep.subr.bf16.mxu1 %v407_v0  ;;  %v147_v22 = vpack.i.b16 %v145_v21, %v145_v21  ;;  %v290_v36 = vld [vmem:[%s482_s4] ss:$0 sm:$0xff] }
  0x17   :  { %v152_v24 = vrot.slane %v147_v22, %v151_v23 }
  0x18   :  { %322 = vmatpush3.bf16.msra.mxu0 %v364_v3  ;;  %342 = vmatpush3.bf16.msra.mxu1 %v372_v13 }
  0x19   :  { %323 = vmatprep.subr.bf16.mxu0 %v407_v0  ;;  %343 = vmatprep.subr.bf16.mxu1 %v407_v0 }
  0x1c   :  { %324 = vmatpush3.bf16.msra.mxu0 %v365_v4  ;;  %344 = vmatpush3.bf16.msra.mxu1 %v373_v14 }
  0x1d   :  { %325 = vmatprep.subr.bf16.mxu0 %v407_v0  ;;  %345 = vmatprep.subr.bf16.mxu1 %v407_v0 }
  0x20   :  { %326 = vmatpush3.bf16.msra.mxu0 %v366_v7  ;;  %346 = vmatpush3.bf16.msra.mxu1 %v374_v15 }
  0x21   :  { %327 = vmatprep.subr.bf16.mxu0 %v407_v0  ;;  %347 = vmatprep.subr.bf16.mxu1 %v407_v0 }
  0x24   :  { %328 = vmatpush3.bf16.msra.mxu0 %v367_v8  ;;  %348 = vmatpush3.bf16.msra.mxu1 %v375_v16 }
  0x25   :  { %329 = vmatprep.subr.bf16.mxu0 %v407_v0  ;;  %349 = vmatprep.subr.bf16.mxu1 %v407_v0 }
  0x28   :  { %330 = vmatpush3.bf16.msra.mxu0 %v368_v9  ;;  %350 = vmatpush3.bf16.msra.mxu1 %v376_v17 }
  0x29   :  { %331 = vmatprep.subr.bf16.mxu0 %v407_v0  ;;  %351 = vmatprep.subr.bf16.mxu1 %v407_v0 }
  0x2c   :  { %332 = vmatpush3.bf16.msra.mxu0 %v369_v10  ;;  %352 = vmatpush3.bf16.msra.mxu1 %v377_v18 }
  0x2f   :  { %334 = vmatmul.mubr.bf16.vlgmr.msra.gmra.mxu0 %v39_v12 }
  0xef   :  { %v138_v25 = vpop.f32.mrf.mxu0 }
  0xf0   :  { %v144_v26 = vpack.c.bf16 %v138_v25, %v138_v25 }
  0xf1   :  { %v335_v27 = vpop.f32.mrf.mxu0 }
  0xf2   :  { %v153_v28 = vadd.bf16 %v152_v24, %v144_v26 }
  0xf3   :  { %v141_v29 = vpop.f32.mrf.mxu0 }
  0xf4   :  { %v155_v30 = vmul.bf16 1060454197, %v153_v28  ;;  %v154_v33 = vmul.bf16 1056980736, %v153_v28 }
  0xf5   :  { %v336_v31 = vpop.f32.mrf.mxu0 }
  0xf6   :  { %378 = verf.bf16 %v155_v30 }
 0x104   :  { %v379_v32 = vpop.eup %378 }
 0x105   :  { %v157_v34 = vadd.bf16 1065369472, %v379_v32 }
 0x107   :  { %v158_v35 = vmul.bf16 %v157_v34, %v154_v33 }
 0x109   :  { %354 = vmatmul.mubr.bf16.vlgmr.msra.gmra.mxu1 %v158_v35 }
 0x1c9   :  { %v264_v37 = vpop.f32.mrf.mxu1 }
 0x1ca   :  { %v265_v38 = vadd.f32 %v290_v36, %v264_v37 }
 0x1cb   :  { %v355_v39 = vpop.f32.mrf.mxu1 }
 0x1cc   :  { %v271_v40 = vmul.f32 0.70710677, %v265_v38  ;;  %v270_v44 = vmul.f32 0.5, %v265_v38 }
 0x1cd   :  { %v267_v41 = vpop.f32.mrf.mxu1 }
 0x1ce   :  { %380 = verf.f32 %v271_v40 }
 0x1cf   :  { %v356_v42 = vpop.f32.mrf.mxu1 }
 0x1db   :  { %v381_v43 = vpop.eup %380 }
 0x1dc   :  { %v273_v45 = vadd.f32 1.0, %v381_v43 }
 0x1de   :  { %v274_v46 = vmul.f32 %v273_v45, %v270_v44 }
 0x1e0   :  { %v275_v47 = vadd.f32 %v274_v46, %v38_v11 }
 0x1e2   :  { %276 = vst [vmem:[%s483_s5] sm:$0xff] %v275_v47 }
 0x1e3   :  { %281 = vsyncpa [#allocation3], 1 }

</bundles_post_ra>
